<compile_context>
chip_gen: v5e
topology: v5e:2x2
jax: 0.10.0
libtpu: 0.0.40
codegen_flags: <defaults>
</compile_context>

<pallas_src>
import jax
import jax.numpy as jnp
from jax.experimental import pallas as pl
from jax.experimental.pallas import tpu as pltpu


def _round_up(x, m):
    return (x + m - 1) // m * m


def _cdiv(a, b):
    return -(-a // b)


def _default_min_tiles():
    """>=2 batch tiles on v7x so both TensorCores get work; 1 elsewhere."""
    try:
        kind = jax.devices()[0].device_kind.lower()
        if "v7" in kind:
            return 2
    except Exception:
        pass
    return 1


def dqn_kernel(x_ref, w1_ref, b1_ref, w2_ref, b2_ref, out_ref):
    # fc1: (TB, in) @ (in, 128) + (1, 128), then ReLU — all in VMEM.
    h = jnp.dot(x_ref[...], w1_ref[...], preferred_element_type=jnp.float32)
    h = jnp.maximum(h + b1_ref[...], 0.0)
    # fc2: (TB, 128) @ (128, out) + (1, out).
    o = jnp.dot(h, w2_ref[...], preferred_element_type=jnp.float32)
    out_ref[...] = (o + b2_ref[...]).astype(out_ref.dtype)


def prepare_dqn_params(w1, b1, w2, b2):
    """One-time parameter layout: (in, out) weights, (1, n) f32 biases.
    Call once at init time, not per forward call."""
    w1 = jnp.asarray(w1, jnp.float32)
    w2 = jnp.asarray(w2, jnp.float32)
    b1 = jnp.asarray(b1, jnp.float32).reshape(1, w1.shape[1])
    b2 = jnp.asarray(b2, jnp.float32).reshape(1, w2.shape[1])
    return w1, b1, w2, b2


def dqn_forward(x, w1, b1, w2, b2, *, block_b=1024, min_tiles=None):
    """x: (B, input_size) f32. w1: (in, hid), b1: (1, hid), w2: (hid, out),
    b2: (1, out) — as produced by prepare_dqn_params. Returns (B, out) f32."""
    B, in_dim = x.shape
    hid = w1.shape[1]
    out_dim = w2.shape[1]

    if min_tiles is None:
        min_tiles = _default_min_tiles()

    # Tile count: enough that each tile fits block_b rows, and at least
    # min_tiles (v7x megacore) once the batch is big enough to split.
    nb = max(_cdiv(B, block_b), min_tiles if B >= 16 else 1)
    bb = _round_up(_cdiv(B, nb), 8)        # multiple-of-8 sublane tile
    b_pad = bb * nb

    x = jnp.asarray(x, jnp.float32)
    if b_pad != B:
        xp = jnp.zeros((b_pad, in_dim), jnp.float32).at[:B].set(x)
    else:
        xp = x

    out = pl.pallas_call(
        dqn_kernel,
        out_shape=jax.ShapeDtypeStruct((b_pad, out_dim), jnp.float32),
        grid=(nb,),
        in_specs=[
            pl.BlockSpec((bb, in_dim), lambda i: (i, 0)),   # x: tiled over batch
            pl.BlockSpec((in_dim, hid), lambda i: (0, 0)),  # weights stay VMEM-resident
            pl.BlockSpec((1, hid), lambda i: (0, 0)),
            pl.BlockSpec((hid, out_dim), lambda i: (0, 0)),
            pl.BlockSpec((1, out_dim), lambda i: (0, 0)),
        ],
        out_specs=pl.BlockSpec((bb, out_dim), lambda i: (i, 0)),
        compiler_params=pltpu.CompilerParams(
            # batch tiles are independent -> shard across TCs on v7x megacore
            dimension_semantics=("parallel",)),
    )(xp, w1, b1, w2, b2)

    # Strip batch-row padding (kept coupled with the padding logic above:
    # padded rows hold relu(b1) @ w2 + b2 garbage and must never leak).
    if b_pad != B:
        out = out[:B]
    return out


def init_dqn_params(key, input_size, hidden_size, output_size):
    """Deterministic init mirroring PyTorch nn.Linear default:
    U(-1/sqrt(fan_in), 1/sqrt(fan_in)) for both weight and bias."""
    k1, k2, k3, k4 = jax.random.split(key, 4)
    bound1 = 1.0 / (input_size ** 0.5)
    bound2 = 1.0 / (hidden_size ** 0.5)
    # Stored as (in, out) — transpose of PyTorch's (out, in).
    w1 = jax.random.uniform(k1, (input_size, hidden_size), jnp.float32,
                            minval=-bound1, maxval=bound1)
    b1 = jax.random.uniform(k2, (hidden_size,), jnp.float32,
                            minval=-bound1, maxval=bound1)
    w2 = jax.random.uniform(k3, (hidden_size, output_size), jnp.float32,
                            minval=-bound2, maxval=bound2)
    b2 = jax.random.uniform(k4, (output_size,), jnp.float32,
                            minval=-bound2, maxval=bound2)
    return prepare_dqn_params(w1, b1, w2, b2)   # one-time layout


if __name__ == "__main__":
    # FlapPyBird DQN: small state vector in, 2 actions out.
    batch = 2
    input_size = 8
    hidden_size = 128
    output_size = 2

    key = jax.random.PRNGKey(0)
    kx, kp = jax.random.split(key)
    x = jax.random.normal(kx, (batch, input_size), dtype=jnp.float32)
    w1, b1, w2, b2 = init_dqn_params(kp, input_size, hidden_size, output_size)

    out = dqn_forward(x, w1, b1, w2, b2)
    out = jax.block_until_ready(out)

    # Pure-JAX reference (same math as the PyTorch module).
    ref = jnp.maximum(x @ w1 + b1, 0.0) @ w2 + b2
    assert out.shape == (batch, output_size)
    assert jnp.allclose(out, ref, atol=1e-5, rtol=1e-5)

    # Replay-buffer-sized batch: exercises the tiled / padded path too.
    xb = jax.random.normal(kx, (300, input_size), dtype=jnp.float32)
    outb = jax.block_until_ready(dqn_forward(xb, w1, b1, w2, b2))
    refb = jnp.maximum(xb @ w1 + b1, 0.0) @ w2 + b2
    assert outb.shape == (300, output_size)
    assert jnp.allclose(outb, refb, atol=1e-5, rtol=1e-5)

    # Large even batch (single tile on v5e/v6e, two tiles on v7x).
    xc = jax.random.normal(kx, (512, input_size), dtype=jnp.float32)
    outc = jax.block_until_ready(dqn_forward(xc, w1, b1, w2, b2))
    refc = jnp.maximum(xc @ w1 + b1, 0.0) @ w2 + b2
    assert outc.shape == (512, output_size)
    assert jnp.allclose(outc, refc, atol=1e-5, rtol=1e-5)

    print("KERNEL_OK")
</pallas_src>

<mosaic_0001>
module attributes {stable_mosaic.version = 11 : i64} {
  func.func @dqn_kernel(%arg0: i32, %arg1: memref<8x8xf32, #tpu.memory_space<vmem>>, %arg2: memref<8x128xf32, #tpu.memory_space<vmem>>, %arg3: memref<1x128xf32, #tpu.memory_space<vmem>>, %arg4: memref<128x2xf32, #tpu.memory_space<vmem>>, %arg5: memref<1x2xf32, #tpu.memory_space<vmem>>, %arg6: memref<8x2xf32, #tpu.memory_space<vmem>>) attributes {dimension_semantics = [#tpu.dimension_semantics<parallel>], iteration_bounds = array<i64: 1>, scalar_prefetch = 0 : i64, scratch_operands = 0 : i64, tpu.core_type = #tpu.core_type<tc>, window_params = [{transform_indices = @transform_0, window_bounds = array<i64: 8, 8>}, {pipeline_mode = #tpu.pipeline_mode<synchronous>, transform_indices = @transform_1, window_bounds = array<i64: 8, 128>}, {pipeline_mode = #tpu.pipeline_mode<synchronous>, transform_indices = @transform_2, window_bounds = array<i64: 1, 128>}, {pipeline_mode = #tpu.pipeline_mode<synchronous>, transform_indices = @transform_3, window_bounds = array<i64: 128, 2>}, {pipeline_mode = #tpu.pipeline_mode<synchronous>, transform_indices = @transform_4, window_bounds = array<i64: 1, 2>}, {transform_indices = @transform_5, window_bounds = array<i64: 8, 2>}]} {
    %c0 = arith.constant 0 : index
    %c0_0 = arith.constant 0 : index
    %0 = vector.load %arg1[%c0, %c0_0] : memref<8x8xf32, #tpu.memory_space<vmem>>, vector<8x8xf32>
    %c0_1 = arith.constant 0 : index
    %c0_2 = arith.constant 0 : index
    %1 = vector.load %arg2[%c0_1, %c0_2] : memref<8x128xf32, #tpu.memory_space<vmem>>, vector<8x128xf32>
    %cst = arith.constant dense<0.000000e+00> : vector<8x128xf32>
    %2 = tpu.matmul %0, %1, %cst {dimension_numbers = #tpu.dot_dimension_numbers<[1], [0], [0], [1], [0, 0, 1, 1], [], []>} : vector<8x8xf32>, vector<8x128xf32>, vector<8x128xf32> -> vector<8x128xf32>
    %c0_3 = arith.constant 0 : index
    %c0_4 = arith.constant 0 : index
    %3 = vector.load %arg3[%c0_3, %c0_4] : memref<1x128xf32, #tpu.memory_space<vmem>>, vector<1x128xf32>
    %4 = vector.broadcast %3 : vector<1x128xf32> to vector<8x128xf32>
    %5 = arith.addf %2, %4 : vector<8x128xf32>
    %cst_5 = arith.constant 0.000000e+00 : f32
    %6 = vector.broadcast %cst_5 : f32 to vector<8x128xf32>
    %7 = arith.maximumf %5, %6 : vector<8x128xf32>
    %c0_6 = arith.constant 0 : index
    %c0_7 = arith.constant 0 : index
    %8 = vector.load %arg4[%c0_6, %c0_7] : memref<128x2xf32, #tpu.memory_space<vmem>>, vector<128x2xf32>
    %cst_8 = arith.constant dense<0.000000e+00> : vector<8x2xf32>
    %9 = tpu.matmul %7, %8, %cst_8 {dimension_numbers = #tpu.dot_dimension_numbers<[1], [0], [0], [1], [0, 0, 1, 1], [], []>} : vector<8x128xf32>, vector<128x2xf32>, vector<8x2xf32> -> vector<8x2xf32>
    %c0_9 = arith.constant 0 : index
    %c0_10 = arith.constant 0 : index
    %10 = vector.load %arg5[%c0_9, %c0_10] : memref<1x2xf32, #tpu.memory_space<vmem>>, vector<1x2xf32>
    %11 = vector.broadcast %10 : vector<1x2xf32> to vector<8x2xf32>
    %12 = arith.addf %9, %11 : vector<8x2xf32>
    %c0_11 = arith.constant 0 : index
    %c0_12 = arith.constant 0 : index
    %13 = vector.load %arg6[%c0_11, %c0_12] : memref<8x2xf32, #tpu.memory_space<vmem>>, vector<8x2xf32>
    tpu.vector_store %arg6[%c0_11, %c0_12], %12 {strides = array<i32>} : memref<8x2xf32, #tpu.memory_space<vmem>>, vector<8x2xf32>,
    return
  }
  func.func @transform_0(%arg0: i32) -> (i32, i32) {
    %c0_i32 = arith.constant 0 : i32
    %c0_i32_0 = arith.constant 0 : i32
    return %arg0, %c0_i32 : i32, i32
  }
  func.func @transform_1(%arg0: i32) -> (i32, i32) {
    %c0_i32 = arith.constant 0 : i32
    %c0_i32_0 = arith.constant 0 : i32
    %c0_i32_1 = arith.constant 0 : i32
    return %c0_i32, %c0_i32_0 : i32, i32
  }
  func.func @transform_2(%arg0: i32) -> (i32, i32) {
    %c0_i32 = arith.constant 0 : i32
    %c0_i32_0 = arith.constant 0 : i32
    %c0_i32_1 = arith.constant 0 : i32
    return %c0_i32, %c0_i32_0 : i32, i32
  }
  func.func @transform_3(%arg0: i32) -> (i32, i32) {
    %c0_i32 = arith.constant 0 : i32
    %c0_i32_0 = arith.constant 0 : i32
    %c0_i32_1 = arith.constant 0 : i32
    return %c0_i32, %c0_i32_0 : i32, i32
  }
  func.func @transform_4(%arg0: i32) -> (i32, i32) {
    %c0_i32 = arith.constant 0 : i32
    %c0_i32_0 = arith.constant 0 : i32
    %c0_i32_1 = arith.constant 0 : i32
    return %c0_i32, %c0_i32_0 : i32, i32
  }
  func.func @transform_5(%arg0: i32) -> (i32, i32) {
    %c0_i32 = arith.constant 0 : i32
    %c0_i32_0 = arith.constant 0 : i32
    return %arg0, %c0_i32 : i32, i32
  }
}

</mosaic_0001>

<bundles_post_ra>
// kernel: tpu_custom_call.1
= control target key start
LH: loop header
LB: loop body
LE: loop exit
PB: predicated region body
PF: predicated region fallthrough
CT: control target
= control target key end

     0   :  { %vm26_vm0 = vcmask 64512   ;;  %vm91_vm1 = vcmask 15360   ;;  %s193_s1 = inlined_call_operand.vmem [shape: f32[8,128], index: 1, kind: input, shape index: {}]   ;;  %s194_s0 = inlined_call_operand.vmem [shape: f32[8,8], index: 0, kind: input, shape index: {}]   ;;  %s195_s3 = inlined_call_operand.vmem [shape: f32[128,2], index: 3, kind: input, shape index: {}]   ;;  %s196_s2 = inlined_call_operand.vmem [shape: f32[1,128], index: 2, kind: input, shape index: {}]   ;;  %s197_s4 = inlined_call_operand.vmem [shape: f32[1,2], index: 4, kind: input, shape index: {}]   ;;  %s198_s5 = inlined_call_operand.vmem [shape: f32[8,2], index: 5, kind: output, shape index: {}]  }
   0x1   :  { %v21_v0 = vld [vmem:[%s193_s1] sm:$0xff]  ;;  %v66_v2 = vld [vmem:[%s195_s3 + $0x78] sm:$0xff]  ;;  %v65_v3 = vld [vmem:[%s195_s3 + $0x70] sm:$0xff] }
   0x2   :  { %v20_v1 = vld [vmem:[%s194_s0] sm:$0xff]  ;;  %45 = vmatpush.msra.mxu0 %v21_v0  ;;  %71 = vmatpush.msra.mxu1 %v66_v2  ;;  %v64_v4 = vld [vmem:[%s195_s3 + $0x68] sm:$0xff]  ;;  %v62_v6 = vld [vmem:[%s195_s3 + $0x58] sm:$0xff] }
   0x3   :  { %97 = vmatmul.msk.f32.vlgmr.msra.gmra.mxu0 %vm26_vm0, %v20_v1  ;;  %v63_v5 = vld [vmem:[%s195_s3 + $0x60] sm:$0xff]  ;;  %v61_v7 = vld [vmem:[%s195_s3 + $0x50] sm:$0xff]  ;;  %v60_v8 = vld [vmem:[%s195_s3 + $0x48] sm:$0xff] }
   0x4   :  { %72 = vmatpush.msra.mxu1 %v65_v3  ;;  %v59_v9 = vld [vmem:[%s195_s3 + $0x40] sm:$0xff]  ;;  %v58_v10 = vld [vmem:[%s195_s3 + $0x38] sm:$0xff]  ;;  %v57_v11 = vld [vmem:[%s195_s3 + $0x30] sm:$0xff] }
   0x5   :  { %v56_v12 = vld [vmem:[%s195_s3 + $0x28] sm:$0xff]  ;;  %v55_v13 = vld [vmem:[%s195_s3 + $0x20] sm:$0xff]  ;;  %v54_v14 = vld [vmem:[%s195_s3 + $0x18] sm:$0xff] }
   0x6   :  { %73 = vmatpush.msra.mxu1 %v64_v4  ;;  %v53_v15 = vld [vmem:[%s195_s3 + $0x10] sm:$0xff]  ;;  %v52_v16 = vld [vmem:[%s195_s3 + $0x8] sm:$0xff]  ;;  %v51_v17 = vld [vmem:[%s195_s3] sm:$0xff] }
   0x7   :  { %v98_v18 = vld [vmem:[%s196_s2] ss:$0 sm:$0xff] }
   0x8   :  { %74 = vmatpush.msra.mxu1 %v63_v5  ;;  %v99_v22 = vld [vmem:[%s197_s4] ss:$0 sm:$0xff] }
   0xa   :  { %75 = vmatpush.msra.mxu1 %v62_v6 }
   0xc   :  { %76 = vmatpush.msra.mxu1 %v61_v7 }
   0xe   :  { %77 = vmatpush.msra.mxu1 %v60_v8 }
  0x10   :  { %78 = vmatpush.msra.mxu1 %v59_v9 }
  0x12   :  { %79 = vmatpush.msra.mxu1 %v58_v10 }
  0x14   :  { %80 = vmatpush.msra.mxu1 %v57_v11 }
  0x16   :  { %81 = vmatpush.msra.mxu1 %v56_v12 }
  0x18   :  { %82 = vmatpush.msra.mxu1 %v55_v13 }
  0x1a   :  { %83 = vmatpush.msra.mxu1 %v54_v14 }
  0x1c   :  { %84 = vmatpush.msra.mxu1 %v53_v15 }
  0x1e   :  { %85 = vmatpush.msra.mxu1 %v52_v16 }
  0x20   :  { %86 = vmatpush.msra.mxu1 %v51_v17 }
  0x80   :  { %v47_v19 = vpop.f32.mrf.mxu0 }
  0x81   :  { %v48_v20 = vadd.f32 %v98_v18, %v47_v19 }
  0x83   :  { %v50_v21 = vmax.f32 %v48_v20, 0.0 }
  0x85   :  { %87 = vmatmul.f32.vlgmr.msra.gmra.mxu1 %v50_v21 }
 0x102   :  { %v88_v23 = vpop.f32.mrf.mxu1 }
 0x103   :  { %v89_v24 = vadd.f32 %v99_v22, %v88_v23 }
 0x105   :  { %92 = vst.msk [vmem:[%s198_s5] sm:$0xff] %vm91_vm1, %v89_v24 }

</bundles_post_ra>
